<compile_context>
chip_gen: v6e
topology: v6e:2x2x1
jax: 0.10.0
libtpu: 0.0.40
codegen_flags: <defaults>
</compile_context>

<pallas_src>
import functools
import math

import jax
import jax.numpy as jnp
from jax.experimental import pallas as pl
from jax.experimental.pallas import tpu as pltpu

_LANE = 128
_SLAB_ROWS = 56      # 33 (aug layer1) + 17 (aug layer2) + 1 (aug layer3) = 51, padded to 8k
_SLAB_COLS = 128     # one lane-width column tile


def init_params(key, input_size=5):
    """Xavier-normal weights (PyTorch (out, in) layout), zero biases."""
    k1, k2, k3 = jax.random.split(key, 3)

    def xavier_normal(k, fan_out, fan_in):
        std = math.sqrt(2.0 / (fan_in + fan_out))
        return jax.random.normal(k, (fan_out, fan_in), dtype=jnp.float32) * std

    w1 = xavier_normal(k1, 32, input_size)
    b1 = jnp.zeros((32,), jnp.float32)
    w2 = xavier_normal(k2, 16, 32)
    b2 = jnp.zeros((16,), jnp.float32)
    w3 = xavier_normal(k3, 1, 16)
    b3 = jnp.zeros((1,), jnp.float32)
    return (w1, b1, w2, b2, w3, b3)


def pack_params(params, input_size=5):
    """Pack the three layers into one (56, 128) f32 slab with biases folded.

    Augmented-layer layout (bias-through-MXU trick):
      rows  0:33 -> W1A: cols [0, IN) = W1, row 32 all-zero (pass-through row);
                    col IN = bias vector [b1; 1.0].  After relu, h1[32, :] == 1.
      rows 33:50 -> W2A (17, 33): rows 0:16 = [W2 | b2 in col 32];
                    row 16 = e_32 (passes the constant-1 channel through relu).
      row  50    -> W3A (1, 17): [W3 | b3 in col 16].
    Only one weight DMA per kernel launch; the slab stays resident in VMEM.
    """
    w1, b1, w2, b2, w3, b3 = params
    slab = jnp.zeros((_SLAB_ROWS, _SLAB_COLS), jnp.float32)
    # Layer 1 (augmented with the constant-1 channel).
    slab = slab.at[0:32, 0:input_size].set(w1)
    slab = slab.at[0:33, input_size].set(
        jnp.concatenate([b1, jnp.ones((1,), jnp.float32)]))
    # Layer 2 (bias folded into column 32, pass-through row 49 keeps the 1).
    slab = slab.at[33:49, 0:32].set(w2)
    slab = slab.at[33:49, 32].set(b2)
    slab = slab.at[49, 32].set(1.0)
    # Layer 3 (bias folded into column 16).
    slab = slab.at[50, 0:16].set(w3[0])
    slab = slab.at[50, 16].set(b3[0])
    return slab


def _mlp_kernel(stats_ref, x_ref, w_ref, o_ref, *, input_size):
    # Global normalization scalars (one-pass stats from the wrapper, SMEM).
    mean = stats_ref[0]
    inv_std = stats_ref[1]

    # (IN, Bt) activation tile, fused subtract + multiply (batch on lanes).
    xn = (x_ref[...] - mean) * inv_std

    # Static views into the packed parameter slab (zero-cost slicing).
    w1 = w_ref[0:33, 0:input_size]                  # (33, IN), row 32 zeros
    b1 = w_ref[0:33, input_size:input_size + 1]     # (33, 1),  b1[32] == 1.0
    w2 = w_ref[33:50, 0:33]                         # (17, 33), b2 folded (col 32)
    w3 = w_ref[50:51, 0:17]                         # (1, 17),  b3 folded (col 16)

    # Layer 1: Linear(IN -> 32) + ReLU; extra row 32 becomes the constant-1
    # channel that carries the layer-2/3 biases through the MXU.
    h1 = jnp.dot(w1, xn, preferred_element_type=jnp.float32) + b1
    h1 = jnp.maximum(h1, 0.0)                       # (33, Bt), h1[32, :] == 1
    # Layer 2: Linear(32 -> 16) + ReLU, bias via the MXU (column 32).
    h2 = jnp.dot(w2, h1, preferred_element_type=jnp.float32)
    h2 = jnp.maximum(h2, 0.0)                       # (17, Bt), h2[16, :] == 1
    # Layer 3: Linear(16 -> 1) + Sigmoid, bias via the MXU, then * 1000.
    logits = jnp.dot(w3, h2, preferred_element_type=jnp.float32)
    # exp on the EUP; exact reciprocal keeps the x1000-scaled output within
    # tight tolerance (approx=True is available if ~0.2 abs error is OK).
    out = 1000.0 * pl.reciprocal(1.0 + jnp.exp(-logits), approx=False)
    o_ref[...] = out.astype(o_ref.dtype)


def transaction_predictor(x, w_slab, *, input_size=5, block_batch=32768):
    """x: (B, input_size) float32. Returns (B, 1) float32."""
    B = x.shape[0]
    x = x.astype(jnp.float32)

    # --- one-pass global statistics (torch.mean / unbiased torch.std) -------
    # sum and sumsq fuse into a single HBM read of x under jit.
    n = x.size
    s1 = jnp.sum(x)
    s2 = jnp.sum(x * x)
    mean = s1 / n
    var = jnp.maximum((s2 - n * mean * mean) / max(n - 1, 1), 0.0)  # clamp vs cancellation
    inv_std = 1.0 / (jnp.sqrt(var) + 1e-8)
    stats = jnp.stack([mean, inv_std]).astype(jnp.float32)

    # --- batch-on-lanes layout & tile sizing ---------------------------------
    # btile: multiple of 128 lanes, capped so the grid keeps >= 2 steps
    # (v7x megacore sharding) and the per-step VMEM footprint stays < 32 MiB.
    btile = min(block_batch, max(_LANE, pl.cdiv(pl.cdiv(B, 2), _LANE) * _LANE))
    num_tiles = max(2, pl.cdiv(B, btile))
    b_pad = num_tiles * btile
    # TODO(synk): this (B, IN) -> (IN, B_pad) transpose is still one XLA
    # read+write of x; folding it into Pallas needs either a 2-phase kernel
    # over narrow native blocks (sparse vregs) or a strided gather DMA.
    xt = jnp.zeros((input_size, b_pad), jnp.float32).at[:, :B].set(x.T)

    out = pl.pallas_call(
        functools.partial(_mlp_kernel, input_size=input_size),
        out_shape=jax.ShapeDtypeStruct((1, b_pad), jnp.float32),
        grid_spec=pltpu.PrefetchScalarGridSpec(
            num_scalar_prefetch=1,                     # stats -> SMEM
            grid=(num_tiles,),
            in_specs=[
                # activations: tiled over the batch (lane) axis, pipelined
                pl.BlockSpec((input_size, btile), lambda i, s: (0, i)),
                # packed weights: constant block -> resident in VMEM across grid
                pl.BlockSpec((_SLAB_ROWS, _SLAB_COLS), lambda i, s: (0, 0)),
            ],
            out_specs=pl.BlockSpec((1, btile), lambda i, s: (0, i)),
        ),
        compiler_params=pltpu.CompilerParams(
            dimension_semantics=("parallel",),       # shard batch tiles across TCs
            vmem_limit_bytes=32 * 1024 * 1024,       # safe on v7x (64 MiB physical)
        ),
    )(stats, xt, w_slab)

    # Back to the module's (B, 1) layout; drop batch padding (tiny copy).
    return out[0, :B].reshape(B, 1)


def _reference(x, params):
    """Pure-JAX reference (mirrors the PyTorch forward)."""
    w1, b1, w2, b2, w3, b3 = params
    n = x.size
    mean = jnp.mean(x)
    std = jnp.sqrt(jnp.sum((x - mean) ** 2) / (n - 1))
    xn = (x - mean) / (std + 1e-8)
    h1 = jnp.maximum(xn @ w1.T + b1, 0.0)
    h2 = jnp.maximum(h1 @ w2.T + b2, 0.0)
    return jax.nn.sigmoid(h2 @ w3.T + b3) * 1000.0


if __name__ == "__main__":
    key = jax.random.PRNGKey(0)
    kx, kp = jax.random.split(key)

    batch = 8
    input_size = 5
    x = jax.random.normal(kx, (batch, input_size), dtype=jnp.float32) * 3.0 + 1.0

    params = init_params(kp, input_size=input_size)
    w_slab = pack_params(params, input_size=input_size)

    fwd = jax.jit(functools.partial(transaction_predictor, input_size=input_size))
    out = fwd(x, w_slab)
    out = jax.block_until_ready(out)

    ref = _reference(x, params)
    assert out.shape == (batch, 1), out.shape
    assert jnp.allclose(out, ref, atol=5e-2, rtol=1e-4), (out, ref)

    print("KERNEL_OK")
</pallas_src>

<mosaic_0001>
module attributes {stable_mosaic.version = 11 : i64} {
  func.func @_mlp_kernel(%arg0: i32, %arg1: memref<2xf32, #tpu.memory_space<smem>>, %arg2: memref<5x128xf32, #tpu.memory_space<vmem>>, %arg3: memref<56x128xf32, #tpu.memory_space<vmem>>, %arg4: memref<1x128xf32, #tpu.memory_space<vmem>>) attributes {dimension_semantics = [#tpu.dimension_semantics<parallel>], iteration_bounds = array<i64: 2>, scalar_prefetch = 1 : i64, scratch_operands = 0 : i64, tpu.core_type = #tpu.core_type<tc>, window_params = [{transform_indices = @transform_0, window_bounds = array<i64: 5, 128>}, {pipeline_mode = #tpu.pipeline_mode<synchronous>, transform_indices = @transform_1, window_bounds = array<i64: 56, 128>}, {transform_indices = @transform_2, window_bounds = array<i64: 1, 128>}]} {
    %c0 = arith.constant 0 : index
    %0 = memref.load %arg1[%c0] : memref<2xf32, #tpu.memory_space<smem>>
    %c1 = arith.constant 1 : index
    %1 = memref.load %arg1[%c1] : memref<2xf32, #tpu.memory_space<smem>>
    %c0_0 = arith.constant 0 : index
    %c0_1 = arith.constant 0 : index
    %2 = vector.load %arg2[%c0_0, %c0_1] : memref<5x128xf32, #tpu.memory_space<vmem>>, vector<5x128xf32>
    %3 = vector.broadcast %0 : f32 to vector<5x128xf32>
    %4 = arith.subf %2, %3 : vector<5x128xf32>
    %5 = vector.broadcast %1 : f32 to vector<5x128xf32>
    %6 = arith.mulf %4, %5 : vector<5x128xf32>
    %c0_2 = arith.constant 0 : index
    %c0_3 = arith.constant 0 : index
    %7 = vector.load %arg3[%c0_2, %c0_3] : memref<56x128xf32, #tpu.memory_space<vmem>>, vector<33x5xf32>
    %c0_4 = arith.constant 0 : index
    %c5 = arith.constant 5 : index
    %8 = vector.load %arg3[%c0_4, %c5] : memref<56x128xf32, #tpu.memory_space<vmem>>, vector<33x1xf32>
    %c33 = arith.constant 33 : index
    %c0_5 = arith.constant 0 : index
    %9 = vector.load %arg3[%c33, %c0_5] : memref<56x128xf32, #tpu.memory_space<vmem>>, vector<17x33xf32>
    %c50 = arith.constant 50 : index
    %c0_6 = arith.constant 0 : index
    %10 = vector.load %arg3[%c50, %c0_6] : memref<56x128xf32, #tpu.memory_space<vmem>>, vector<1x17xf32>
    %cst = arith.constant dense<0.000000e+00> : vector<33x128xf32>
    %11 = tpu.matmul %7, %6, %cst {dimension_numbers = #tpu.dot_dimension_numbers<[1], [0], [0], [1], [0, 0, 1, 1], [], []>} : vector<33x5xf32>, vector<5x128xf32>, vector<33x128xf32> -> vector<33x128xf32>
    %12 = vector.broadcast %8 : vector<33x1xf32> to vector<33x128xf32>
    %13 = arith.addf %11, %12 : vector<33x128xf32>
    %cst_7 = arith.constant 0.000000e+00 : f32
    %14 = vector.broadcast %cst_7 : f32 to vector<33x128xf32>
    %15 = arith.maximumf %13, %14 : vector<33x128xf32>
    %cst_8 = arith.constant dense<0.000000e+00> : vector<17x128xf32>
    %16 = tpu.matmul %9, %15, %cst_8 {dimension_numbers = #tpu.dot_dimension_numbers<[1], [0], [0], [1], [0, 0, 1, 1], [], []>} : vector<17x33xf32>, vector<33x128xf32>, vector<17x128xf32> -> vector<17x128xf32>
    %cst_9 = arith.constant 0.000000e+00 : f32
    %17 = vector.broadcast %cst_9 : f32 to vector<17x128xf32>
    %18 = arith.maximumf %16, %17 : vector<17x128xf32>
    %cst_10 = arith.constant dense<0.000000e+00> : vector<1x128xf32>
    %19 = tpu.matmul %10, %18, %cst_10 {dimension_numbers = #tpu.dot_dimension_numbers<[1], [0], [0], [1], [0, 0, 1, 1], [], []>} : vector<1x17xf32>, vector<17x128xf32>, vector<1x128xf32> -> vector<1x128xf32>
    %cst_11 = arith.constant 0.000000e+00 : f32
    %20 = vector.broadcast %cst_11 : f32 to vector<1x128xf32>
    %21 = arith.subf %20, %19 : vector<1x128xf32>
    %22 = math.exp %21 : vector<1x128xf32>
    %cst_12 = arith.constant 1.000000e+00 : f32
    %23 = vector.broadcast %cst_12 : f32 to vector<1x128xf32>
    %24 = arith.addf %23, %22 : vector<1x128xf32>
    %25 = tpu.reciprocal %24 : vector<1x128xf32> -> vector<1x128xf32>
    %cst_13 = arith.constant 1.000000e+03 : f32
    %26 = vector.broadcast %cst_13 : f32 to vector<1x128xf32>
    %27 = arith.mulf %26, %25 : vector<1x128xf32>
    %c0_14 = arith.constant 0 : index
    %c0_15 = arith.constant 0 : index
    %28 = vector.load %arg4[%c0_14, %c0_15] : memref<1x128xf32, #tpu.memory_space<vmem>>, vector<1x128xf32>
    tpu.vector_store %arg4[%c0_14, %c0_15], %27 {strides = array<i32>} : memref<1x128xf32, #tpu.memory_space<vmem>>, vector<1x128xf32>,
    return
  }
  func.func @transform_0(%arg0: i32, %arg1: memref<2xf32, #tpu.memory_space<smem>>) -> (i32, i32) {
    %c0_i32 = arith.constant 0 : i32
    %c0_i32_0 = arith.constant 0 : i32
    return %c0_i32, %arg0 : i32, i32
  }
  func.func @transform_1(%arg0: i32, %arg1: memref<2xf32, #tpu.memory_space<smem>>) -> (i32, i32) {
    %c0_i32 = arith.constant 0 : i32
    %c0_i32_0 = arith.constant 0 : i32
    %c0_i32_1 = arith.constant 0 : i32
    return %c0_i32, %c0_i32_0 : i32, i32
  }
  func.func @transform_2(%arg0: i32, %arg1: memref<2xf32, #tpu.memory_space<smem>>) -> (i32, i32) {
    %c0_i32 = arith.constant 0 : i32
    %c0_i32_0 = arith.constant 0 : i32
    return %c0_i32, %arg0 : i32, i32
  }
}

</mosaic_0001>

<bundles_post_ra>
// kernel: transaction_predictor.1
= control target key start
LH: loop header
LB: loop body
LE: loop exit
PB: predicated region body
PF: predicated region fallthrough
CT: control target
= control target key end

     0   :  { %s751_s0 = inlined_call_operand.vmem [shape: f32[2], index: 0, kind: input, shape index: {}]   ;;  %s752_s1 = inlined_call_operand.vmem [shape: f32[5,256], index: 1, kind: input, shape index: {}]   ;;  %s753_s2 = inlined_call_operand.vmem [shape: f32[56,128], index: 2, kind: input, shape index: {}]   ;;  %s754_s3 = inlined_call_operand.vmem [shape: f32[1,256], index: 3, kind: output, shape index: {}]  }
   0x1   :  { %s8_s14 = sshll.u32 %s751_s0, 4  ;;  %s9_s14 = int_to_ptr.vmem [resolvable:$true] %s8_s14 }
   0x2   :  { %s625_s15 = scalar_lea.vmem %s9_s14, 16  ;;  %p630_p1 = scmp.lt.s32.totalorder %s9_s14, %s9_s14 }
   0x3   :  { %p626_p0 = scmp.ne.s32.totalorder %s9_s14, %s625_s15  ;;  %p631_p2 = scmp.lt.s32.totalorder %s625_s15, %s625_s15 }
   0x5   :  { %p632_p3 = por %p631_p2, %p630_p1 }
   0x7   :  { %p633_p4 = pnand %p632_p3, %p626_p0 }
   0x9   :  { %636 = shalt.err (!%p633_p4)  }
   0xa   :  { %s647_s16 = smov [#allocation3]  }
   0xb   :  { %11 = dma.vmem_to_smem %s9_s14, 16, %s647_s16, [#allocation2] }
   0xc   :  { %641 = dma.done.wait [#allocation2], 16 }
   0xd   :  { %642 = vsyncadd [#allocation2], 4294967280 }
   0xe   :  { %13 = sfence }
   0xf   :  { %s674_s17 = smov 0  }
  0x10 LB: > { %s523_s0 = sadd.s32 4294967295, %s645_s17   ;;  %p527_p5 = scmp.ge.s32.totalorder %s645_s17, 1  ;;  %s645_s17 = sphi %s674_s17, %s19_s17  }
  0x11   : > { %p118_p6 = scmp.lt.s32.totalorder %s645_s17, 3 }
  0x13   : > { %p119_p7 = pnand %p527_p5, %p118_p6 }
  0x14   : > { %p137_p8 = scmp.lt.s32.totalorder (!%p119_p7), %s523_s0, 1  ;;  %s144_s18 = sld [smem:[#allocation3]] (!%p119_p7) }
  0x15   : > { %122 = sbr.rel (%p119_p7) target bundleno = 696 (0x2b8), region = 28  ;;  %s529_s19 = sld [smem:[#allocation3 + $0x1]] (!%p119_p7) }
  0x1a   : > { %v648_v0 = vmov 0.0   ;;  %vm649_vm0 = vmmov 0   ;;  %s756_s0 = smov (!%p137_p8, %s523_s0), 1  ;;  %v153_v1 = vld [vmem:[%s753_s2 + $0x10] sm:$0xff]  ;;  %v155_v2 = vld [vmem:[%s753_s2 + $0x20] sm:$0x1]  ;;  %v147_v5 = vstv %s144_s18 }
  0x1b   : > { %562 = vmatprep.subr.mxu0 %v648_v0  ;;  %564 = vmatprep.mubr.msk.f32.mxu0 %vm649_vm0, %v648_v0  ;;  %v650_v3 = vmov 5   ;;  %s528_s24 = sshll.u32 %s756_s0, 3  ;;  %v149_v7 = vstv %s529_s19  ;;  %v152_v8 = vld [vmem:[%s753_s2 + $0x8] sm:$0xff]  ;;  %v154_v9 = vld [vmem:[%s753_s2 + $0x18] sm:$0xff]  ;;  %vm196_vm1 = vcmask 1044480   ;;  %v151_v11 = vld [vmem:[%s753_s2] sm:$0xff]  ;;  %s143_s18 = scalar_lea.vmem %s754_s3, %s756_s0 }
  0x1c   : > { %579 = vmatprep.subr.mxu1 %v648_v0  ;;  %589 = vmatprep.mubr.msk.f32.mxu1 %vm649_vm0, %v648_v0  ;;  %s140_s27 = scalar_lea.vmem %s752_s1, %s528_s24  ;;  %vm185_vm2 = vcmask 39936   ;;  %vm305_vm3 = vcmask 1040384   ;;  %v156_v37 = vld [vmem:[%s753_s2 + $0x21] sm:$0xff]  ;;  %vm295_vm4 = vcmask 269312   ;;  %v157_v38 = vld [vmem:[%s753_s2 + $0x29] sm:$0xff]  ;;  %vm392_vm5 = vcmask 138240  }
  0x1d   : > { %619 = vset.pattern.permute.xlu0 %v650_v3  ;;  %620 = vset.pattern.permute.xlu1 %v650_v3  ;;  %v146_v4 = vld [vmem:[%s140_s27] sm:$0x1f]  ;;  %v158_v39 = vld [vmem:[%s753_s2 + $0x31] sm:$0x1]  ;;  %v159_v49 = vld [vmem:[%s753_s2 + $0x32] sm:$0x1] }
  0x1e   : > { %182 = vperm.xlu0 %619, %v155_v2   ;;  %172 = vperm.xlu1 %620, %v153_v1   ;;  %v148_v6 = vsub.f32 %v146_v4, %v147_v5 }
  0x20   : > { %v150_v10 = vmul.f32 %v149_v7, %v148_v6 }
  0x22   : > { %177 = vperm.xlu0 %619, %v154_v9   ;;  %167 = vperm.xlu1 %620, %v152_v8  }
  0x23   : > { %563 = vmatpush3.msk.msra.mxu0 %vm196_vm1, %v150_v10 }
  0x24   : > { %565 = vmatmul.mubr.msk.f32.vlgmr.msra.gmra.mxu0 %vm185_vm2, %v151_v11  ;;  %598 = vmatprep.subr.mxu0 %v648_v0 }
  0x25   : > { %567 = vmatprep.mubr.msk.f32.mxu0 %vm649_vm0, %v648_v0 }
  0x26   : > { %162 = vperm.xlu0 %619, %v151_v11  }
  0x28   : > { %568 = vmatmul.mubr.msk.f32.gmra.mxu0 %vm185_vm2, %v152_v8 }
  0x29   : > { %570 = vmatprep.mubr.msk.f32.mxu0 %vm649_vm0, %v648_v0 }
  0x2c   : > { %571 = vmatmul.mubr.msk.f32.gmra.mxu0 %vm185_vm2, %v153_v1 }
  0x2d   : > { %573 = vmatprep.mubr.msk.f32.mxu0 %vm649_vm0, %v648_v0 }
  0x30   : > { %574 = vmatmul.mubr.msk.f32.gmra.mxu0 %vm185_vm2, %v154_v9 }
  0x31   : > { %576 = vmatprep.mubr.msk.f32.mxu0 %vm649_vm0, %v648_v0 }
  0x34   : > { %577 = vmatmul.mubr.msk.f32.gmra.mxu0 %vm185_vm2, %v155_v2 }
  0x35   : > { %604 = vmatprep.mubr.msk.f32.mxu0 %vm649_vm0, %v648_v0 }
  0x99   : > { %v183_v16 = vpop.permute.xlu0 %182  ;;  %v173_v19 = vpop.permute.xlu1 %172 }
  0x9d   : > { %v178_v21 = vpop.permute.xlu0 %177  ;;  %v168_v26 = vpop.permute.xlu1 %167 }
  0xa1   : > { %v163_v30 = vpop.permute.xlu0 %162 }
  0xe4   : > { %v266_v12 = vpop.f32.mrf.mxu0 }
  0xe5   : > { %v267_v33 = vadd.f32 %v266_v12, %v163_v30 }
  0xe6   : > { %v566_v13 = vpop.f32.mrf.mxu0 }
  0xe7   : > { %v290_v36 = vmax.f32 %v267_v33, 0.0 }
  0xe8   : > { %v271_v14 = vpop.f32.mrf.mxu0 }
  0xe9   : > { %v272_v31 = vadd.f32 %v271_v14, %v168_v26 }
  0xea   : > { %v569_v15 = vpop.f32.mrf.mxu0 }
  0xeb   : > { %v291_v35 = vmax.f32 %v272_v31, 0.0 }
  0xec   : > { %v276_v17 = vpop.f32.mrf.mxu0 }
  0xed   : > { %v277_v28 = vadd.f32 %v276_v17, %v173_v19 }
  0xee   : > { %v572_v18 = vpop.f32.mrf.mxu0 }
  0xef   : > { %v292_v34 = vmax.f32 %v277_v28, 0.0 }
  0xf0   : > { %v281_v20 = vpop.f32.mrf.mxu0 }
  0xf1   : > { %v282_v24 = vadd.f32 %v281_v20, %v178_v21 }
  0xf2   : > { %v575_v22 = vpop.f32.mrf.mxu0 }
  0xf3   : > { %v293_v32 = vmax.f32 %v282_v24, 0.0 }
  0xf4   : > { %v286_v23 = vpop.f32.mrf.mxu0 }
  0xf5   : > { %v287_v25 = vadd.f32 %v286_v23, %v183_v16 }
  0xf6   : > { %v578_v27 = vpop.f32.mrf.mxu0 }
  0xf7   : > { %v294_v29 = vmax.f32 %v287_v25, 0.0 }
  0xf9   : > { %580 = vmatpush3.msk.msra.mxu1 %vm305_vm3, %v294_v29 }
  0xfa   : > { %581 = vmatprep.subr.mxu1 %v648_v0 }
  0xfb   : > { %582 = vmatpush3.msra.mxu1 %v293_v32 }
  0xfc   : > { %583 = vmatprep.subr.mxu1 %v648_v0 }
  0xfd   : > { %584 = vmatpush3.msra.mxu1 %v292_v34 }
  0xfe   : > { %585 = vmatprep.subr.mxu1 %v648_v0 }
  0xff   : > { %586 = vmatpush3.msra.mxu1 %v291_v35 }
 0x100   : > { %587 = vmatprep.subr.mxu1 %v648_v0 }
 0x101   : > { %588 = vmatpush3.msra.mxu1 %v290_v36 }
 0x102   : > { %590 = vmatmul.mubr.msk.f32.vlgmr.msra.gmra.mxu1 %vm295_vm4, %v156_v37 }
 0x103   : > { %592 = vmatprep.mubr.msk.f32.mxu1 %vm649_vm0, %v648_v0 }
 0x106   : > { %593 = vmatmul.mubr.msk.f32.gmra.mxu1 %vm295_vm4, %v157_v38 }
 0x107   : > { %595 = vmatprep.mubr.msk.f32.mxu1 %vm649_vm0, %v648_v0 }
 0x10a   : > { %596 = vmatmul.mubr.msk.f32.gmra.mxu1 %vm295_vm4, %v158_v39 }
 0x1c2   : > { %v375_v40 = vpop.f32.mrf.mxu1 }
 0x1c3   : > { %v389_v48 = vmax.f32 %v375_v40, 0.0 }
 0x1c4   : > { %v591_v41 = vpop.f32.mrf.mxu1 }
 0x1c6   : > { %v380_v42 = vpop.f32.mrf.mxu1 }
 0x1c7   : > { %v390_v47 = vmax.f32 %v380_v42, 0.0 }
 0x1c8   : > { %v594_v43 = vpop.f32.mrf.mxu1 }
 0x1ca   : > { %v385_v44 = vpop.f32.mrf.mxu1 }
 0x1cb   : > { %v391_v45 = vmax.f32 %v385_v44, 0.0 }
 0x1cc   : > { %v597_v46 = vpop.f32.mrf.mxu1 }
 0x1cd   : > { %599 = vmatpush3.msk.msra.mxu0 %vm305_vm3, %v391_v45 }
 0x1ce   : > { %600 = vmatprep.subr.mxu0 %v648_v0 }
 0x1cf   : > { %601 = vmatpush3.msra.mxu0 %v390_v47 }
 0x1d0   : > { %602 = vmatprep.subr.mxu0 %v648_v0 }
 0x1d1   : > { %603 = vmatpush3.msra.mxu0 %v389_v48 }
 0x1d2   : > { %605 = vmatmul.mubr.msk.f32.vlgmr.msra.gmra.mxu0 %vm392_vm5, %v159_v49 }
 0x292   : > { %v465_v50 = vpop.f32.mrf.mxu0 }
 0x293   : > { %v469_v51 = vsub.f32 0.0, %v465_v50 }
 0x294   : > { %v606_v52 = vpop.f32.mrf.mxu0 }
 0x295   : > { %v470_v53 = vmul.f32 1.442695, %v469_v51 }
 0x297   : > { %621 = vpow2.f32 %v470_v53 }
 0x2a4   : > { %v622_v54 = vpop.eup %621 }
 0x2a5   : > { %v472_v55 = vadd.f32 1.0, %v622_v54 }
 0x2a7   : > { %623 = vrcp.f32 %v472_v55 }
 0x2b4   : > { %v624_v56 = vpop.eup %623 }
 0x2b5   : > { %v474_v57 = vmul.f32 1000.0, %v624_v56 }
 0x2b7   : > { %475 = vst [vmem:[%s143_s18] sm:$0x1] %v474_v57 }
 0x2b8 PF: > { %s19_s17 = sadd.s32 1, %s645_s17  }
 0x2b9   : > { %p16_p9 = scmp.ge.s32.totalorder %s19_s17, 4  }
 0x2bb   :  { %18 = sbr.rel (!%p16_p9) target bundleno = 16 (0x10), region = 58 }

</bundles_post_ra>
